<compile_context>
chip_gen: v7x
topology: tpu7x:2x2x1
jax: 0.10.0
libtpu: 0.0.40
codegen_flags: <defaults>
</compile_context>

<pallas_src>
import functools
import math

import jax
import jax.numpy as jnp
from jax import lax
from jax.experimental import pallas as pl
from jax.experimental.pallas import tpu as pltpu


# ----------------------------------------------------------------------------
# Helpers
# ----------------------------------------------------------------------------
def _bce_zero(x):
    # BCEWithLogits(x, 0) == softplus(x), numerically stable form.
    return jnp.maximum(x, 0.0) + jnp.log(1.0 + jnp.exp(-jnp.abs(x)))


def _bce(x, y):
    # BCEWithLogitsLoss(reduction='none'): max(x,0) - x*y + log1p(exp(-|x|))
    return jnp.maximum(x, 0.0) - x * y + jnp.log1p(jnp.exp(-jnp.abs(x)))


def _ciou_loss(b1, b2):
    # elementwise CIoU loss over (..., 4) boxes; mirrors torch _compute_ciou.
    eps = 1e-5
    a1 = (b1[..., 2] - b1[..., 0]) * (b1[..., 3] - b1[..., 1])
    a2 = (b2[..., 2] - b2[..., 0]) * (b2[..., 3] - b2[..., 1])
    left = jnp.maximum(b1[..., 0], b2[..., 0])
    top = jnp.maximum(b1[..., 1], b2[..., 1])
    right = jnp.minimum(b1[..., 2], b2[..., 2])
    bottom = jnp.minimum(b1[..., 3], b2[..., 3])
    wh = jnp.maximum(right - left, 0.0) * jnp.maximum(bottom - top, 0.0)
    iou = wh / (a1 + a2 - wh + 1e-6)
    b1cx = (b1[..., 0] + b1[..., 2]) * 0.5; b1cy = (b1[..., 1] + b1[..., 3]) * 0.5
    b2cx = (b2[..., 0] + b2[..., 2]) * 0.5; b2cy = (b2[..., 1] + b2[..., 3]) * 0.5
    cx1 = jnp.minimum(b1[..., 0], b2[..., 0]); cy1 = jnp.minimum(b1[..., 1], b2[..., 1])
    cx2 = jnp.maximum(b1[..., 2], b2[..., 2]); cy2 = jnp.maximum(b1[..., 3], b2[..., 3])
    c_diag = jnp.maximum((cx2 - cx1) ** 2 + (cy2 - cy1) ** 2, eps)
    center = (b1cx - b2cx) ** 2 + (b1cy - b2cy) ** 2
    w1 = jnp.maximum(b1[..., 2] - b1[..., 0], eps)
    h1 = jnp.maximum(b1[..., 3] - b1[..., 1], eps)
    w2 = jnp.maximum(b2[..., 2] - b2[..., 0], eps)
    h2 = jnp.maximum(b2[..., 3] - b2[..., 1], eps)
    v = (4.0 / (math.pi ** 2)) * (jnp.arctan(w2 / h2) - jnp.arctan(w1 / h1)) ** 2
    v = jnp.clip(v, 0.0, 1.0)
    alpha = jnp.clip(v / (1.0 - iou + v + eps), 0.0, 1.0)
    ciou = iou - center / c_diag - alpha * v
    return jnp.clip(1.0 - ciou, 0.0, 2.0)


def _round_up(x, m):
    return ((x + m - 1) // m) * m


# ----------------------------------------------------------------------------
# Pallas kernel: grid = (batch, anchor-split, chunk); chunk axis is a reduction
# ----------------------------------------------------------------------------
def yolo_match_kernel(boxes_ref, conf_ref, tb_ref,
                      idx_out_ref, iou_out_ref, bce_out_ref,
                      best_iou_ref, best_idx_ref, bce0_ref):
    # boxes_ref : (1, 4, TN)        coord-major predicted boxes for this chunk
    # conf_ref  : (1, TN//128, 128) objectness logits (sublane-packed)
    # tb_ref    : (1, Mp, 4)        padded target boxes
    # idx_out   : (1, 1, Mp, 128)   best anchor index per target (int32)
    # iou_out   : (1, 1, Mp, 128)   best IoU per target (for split merging)
    # bce_out   : (1, 1, 8, 128)    sum over this split of BCE(conf, 0)
    s = pl.program_id(1)
    n = pl.program_id(2)
    nc = pl.num_programs(2)

    @pl.when(n == 0)
    def _init():
        best_iou_ref[...] = jnp.full_like(best_iou_ref, -1.0)
        best_idx_ref[...] = jnp.zeros_like(best_idx_ref)
        bce0_ref[...] = jnp.zeros_like(bce0_ref)

    boxes = boxes_ref[0]                     # (4, TN) f32, anchors lane-dense
    tb = tb_ref[0]                           # (Mp, 4) f32
    TN = boxes.shape[1]
    Mp = tb.shape[0]

    px1 = boxes[0:1, :]; py1 = boxes[1:2, :]
    px2 = boxes[2:3, :]; py2 = boxes[3:4, :]
    tx1 = tb[:, 0:1]; ty1 = tb[:, 1:2]; tx2 = tb[:, 2:3]; ty2 = tb[:, 3:4]

    # ---- pairwise IoU (targets x anchor chunk) ------------------------------
    area_p = (px2 - px1) * (py2 - py1)                       # (1, TN)
    area_t = (tx2 - tx1) * (ty2 - ty1)                       # (Mp, 1)
    ix1 = jnp.maximum(tx1, px1); iy1 = jnp.maximum(ty1, py1)
    ix2 = jnp.minimum(tx2, px2); iy2 = jnp.minimum(ty2, py2)
    inter = jnp.maximum(ix2 - ix1, 0.0) * jnp.maximum(iy2 - iy1, 0.0)
    den = area_p + area_t - inter + 1e-5                     # (Mp, TN)
    # EUP approx reciprocal + one Newton step (keeps argmax selection ~exact);
    # no clip: only the argmax of these values is consumed.
    r = pl.reciprocal(den, approx=True)
    r = r * (2.0 - den * r)
    iou = inter * r                                          # (Mp, TN)

    # ---- chunk-local argmax (first occurrence) ------------------------------
    lane = lax.broadcasted_iota(jnp.int32, (Mp, TN), 1)
    chunk_max = jnp.max(iou, axis=-1, keepdims=True)                  # (Mp, 1)
    local_idx = jnp.min(jnp.where(iou == chunk_max, lane, TN),
                        axis=-1, keepdims=True)                       # (Mp, 1)

    # ---- running best across chunks (strict > keeps earliest chunk) ---------
    upd = chunk_max > best_iou_ref[...]
    best_iou_ref[...] = jnp.where(upd, chunk_max, best_iou_ref[...])
    base = (s * nc + n) * TN                                 # global anchor base
    best_idx_ref[...] = jnp.where(upd, local_idx + base, best_idx_ref[...])

    # ---- objectness BCE against zero target, fully packed vregs -------------
    bce0_ref[...] += _bce_zero(conf_ref[0])                  # (TN//128, 128)

    @pl.when(n == nc - 1)
    def _finalize():
        # single full-block lane-dense stores
        idx_out_ref[0, 0] = jnp.broadcast_to(best_idx_ref[...], (Mp, 128))
        iou_out_ref[0, 0] = jnp.broadcast_to(best_iou_ref[...], (Mp, 128))
        bce_out_ref[0, 0] = jnp.full((8, 128), jnp.sum(bce0_ref[...]),
                                     jnp.float32)


# ----------------------------------------------------------------------------
# Wrapper (layout plumbing + tiny O(B*M) epilogue; jit-compatible)
# ----------------------------------------------------------------------------
def yolo_loss(pred_boxes, pred_conf, pred_cls, tgt_boxes, tgt_labels,
              num_classes, anchors=None, lambda_coord=5.0, lambda_noobj=0.5,
              anchor_chunk=1024, anchor_splits=None):
    # `anchors` / `lambda_noobj` accepted for signature parity; unused like the
    # PyTorch forward.
    del anchors, lambda_noobj
    B, N, _ = pred_boxes.shape
    M = tgt_boxes.shape[1]
    C = num_classes
    f32 = jnp.float32

    # v7x has 2 TensorCores: guarantee >=2-way parallel grid work when B == 1.
    S = anchor_splits if anchor_splits is not None else (2 if B == 1 else 1)
    S = max(1, int(S))

    # Chunk must be a multiple of 1024 so the conf block fills (8,128) vregs.
    tn = max(1024, (int(anchor_chunk) // 1024) * 1024)
    NC = max(1, -(-N // (S * tn)))          # chunks per split
    Np = S * tn * NC                        # padded anchor count
    Mp = _round_up(M, 8)                    # pad targets to full sublanes

    # Coord-major predicted boxes (B, 4, Np); anchors lane-dense.  Dummy
    # anchors live at -1e6 so they can never win the IoU argmax.
    # TODO(synk): emit coord-major boxes from the detection head to remove this
    # last wrapper-side relayout pass (8N floats of extra HBM traffic).
    boxes_t = jnp.transpose(pred_boxes.astype(f32), (0, 2, 1))          # (B,4,N)
    boxes_t = jnp.pad(boxes_t, ((0, 0), (0, 0), (0, Np - N)),
                      constant_values=-1e6)                             # (B,4,Np)

    # Objectness logits: zero-copy reshape to (B, Np/128, 128); pad with -1e9
    # so padded lanes contribute exactly 0 to BCE(conf, 0).
    conf = jnp.pad(pred_conf.astype(f32).reshape(B, N),
                   ((0, 0), (0, Np - N)), constant_values=-1e9)
    conf = conf.reshape(B, Np // 128, 128)

    tb = jnp.pad(tgt_boxes.astype(f32), ((0, 0), (0, Mp - M), (0, 0)))  # (B,Mp,4)

    idx_out, iou_out, bce_out = pl.pallas_call(
        yolo_match_kernel,
        out_shape=(jax.ShapeDtypeStruct((B, S, Mp, 128), jnp.int32),
                   jax.ShapeDtypeStruct((B, S, Mp, 128), jnp.float32),
                   jax.ShapeDtypeStruct((B, S, 8, 128), jnp.float32)),
        grid_spec=pltpu.PrefetchScalarGridSpec(
            num_scalar_prefetch=0,
            grid=(B, S, NC),
            in_specs=[
                pl.BlockSpec((1, 4, tn), lambda b, s, n: (b, 0, s * NC + n)),
                pl.BlockSpec((1, tn // 128, 128),
                             lambda b, s, n: (b, s * NC + n, 0)),
                pl.BlockSpec((1, Mp, 4), lambda b, s, n: (b, 0, 0)),
            ],
            out_specs=[
                pl.BlockSpec((1, 1, Mp, 128), lambda b, s, n: (b, s, 0, 0)),
                pl.BlockSpec((1, 1, Mp, 128), lambda b, s, n: (b, s, 0, 0)),
                pl.BlockSpec((1, 1, 8, 128), lambda b, s, n: (b, s, 0, 0)),
            ],
            scratch_shapes=[
                pltpu.VMEM((Mp, 1), jnp.float32),          # running best IoU
                pltpu.VMEM((Mp, 1), jnp.int32),            # running best index
                pltpu.VMEM((tn // 128, 128), jnp.float32), # BCE(conf,0) accum
            ]),
        compiler_params=pltpu.CompilerParams(
            dimension_semantics=("parallel", "parallel", "arbitrary")),
    )(boxes_t, conf, tb)

    # ---- merge the anchor splits (prefer lower split on ties -> first occ.) -
    best_idx = idx_out[:, 0, :, 0]                                   # (B, Mp)
    best_iou = iou_out[:, 0, :, 0]
    for s in range(1, S):
        take = iou_out[:, s, :, 0] > best_iou
        best_idx = jnp.where(take, idx_out[:, s, :, 0], best_idx)
        best_iou = jnp.where(take, iou_out[:, s, :, 0], best_iou)
    bce0_total = jnp.sum(bce_out[:, :, 0, 0], axis=1)                # (B,)
    best_idx = jnp.clip(best_idx, 0, N - 1)

    # ---- tiny O(B*M) epilogue: gathers, CIoU, class BCE, objectness ---------
    matched_boxes = jnp.take_along_axis(pred_boxes.astype(f32),
                                        best_idx[:, :, None], axis=1)  # (B,Mp,4)
    matched_conf = jnp.take_along_axis(pred_conf.astype(f32)[:, :, 0],
                                       best_idx, axis=1)               # (B,Mp)
    matched_cls = jnp.take_along_axis(pred_cls.astype(f32),
                                      best_idx[:, :, None], axis=1)    # (B,Mp,C)

    valid = (jnp.arange(Mp) < M)[None, :]                              # (1,Mp)
    validf = valid.astype(f32)
    labels_p = jnp.pad(tgt_labels, ((0, 0), (0, Mp - M)))
    tcls = jax.nn.one_hot(labels_p, C, dtype=f32)                      # (B,Mp,C)

    box_per = jnp.sum(_ciou_loss(matched_boxes, tb) * validf, axis=1) / M
    cls_per = jnp.sum(_bce(matched_cls, tcls) * validf[:, :, None],
                      axis=(1, 2)) / (M * C)

    # Objectness: BCE(conf, mask); BCE(x,1) - BCE(x,0) == -x, so flip the mask
    # once per *distinct* matched anchor.  Padded targets get unique negative
    # sentinels so they can neither collide nor contribute.
    sentinel = -(jnp.arange(Mp, dtype=best_idx.dtype) + 1)[None, :]
    midx = jnp.where(valid, best_idx, sentinel)
    dup = midx[:, :, None] == midx[:, None, :]                         # (B,Mp,Mp)
    lower = jnp.tril(jnp.ones((Mp, Mp), dtype=bool), k=-1)
    is_first = jnp.logical_not(jnp.any(dup & lower[None], axis=2)) & valid
    obj_per = (bce0_total
               - jnp.sum(jnp.where(is_first, matched_conf, 0.0), axis=1)) / N

    box_loss = jnp.mean(box_per)
    obj_loss = jnp.mean(obj_per)
    cls_loss = jnp.mean(cls_per)
    total = lambda_coord * box_loss + obj_loss + cls_loss

    # Device arrays (no host syncs) -> wrapper stays jit/grad friendly.
    loss_dict = {'total_loss': total, 'loss': total, 'box_loss': box_loss,
                 'obj_loss': obj_loss, 'class_loss': cls_loss}
    return total, loss_dict


# ----------------------------------------------------------------------------
# Pure-JAX reference (mirrors the PyTorch forward) for verification
# ----------------------------------------------------------------------------
def _ref_bce(x, y):
    return jnp.maximum(x, 0.0) - x * y + jnp.log(1.0 + jnp.exp(-jnp.abs(x)))


def reference_yolo_loss(pred_boxes, pred_conf, pred_cls, tgt_boxes, tgt_labels,
                        num_classes, lambda_coord=5.0):
    B, N, _ = pred_boxes.shape
    box_t = obj_t = cls_t = 0.0
    for i in range(B):
        pb = pred_boxes[i]; tb = tgt_boxes[i]
        a1 = (pb[:, 2] - pb[:, 0]) * (pb[:, 3] - pb[:, 1])
        a2 = (tb[:, 2] - tb[:, 0]) * (tb[:, 3] - tb[:, 1])
        ix1 = jnp.maximum(pb[:, 0][:, None], tb[:, 0][None, :])
        iy1 = jnp.maximum(pb[:, 1][:, None], tb[:, 1][None, :])
        ix2 = jnp.minimum(pb[:, 2][:, None], tb[:, 2][None, :])
        iy2 = jnp.minimum(pb[:, 3][:, None], tb[:, 3][None, :])
        inter = jnp.maximum(ix2 - ix1, 0.0) * jnp.maximum(iy2 - iy1, 0.0)
        union = a1[:, None] + a2[None, :] - inter
        iou = jnp.clip(inter / (union + 1e-5), 0.0, 1.0)      # (N, M)
        best_idx = jnp.argmax(iou, axis=0)                    # (M,)
        obj_mask = jnp.zeros((N, 1), jnp.float32).at[best_idx, 0].set(1.0)
        obj_t += jnp.mean(_ref_bce(pred_conf[i], obj_mask))
        box_t += jnp.mean(_ciou_loss(pb[best_idx], tb))
        tcls = jax.nn.one_hot(tgt_labels[i], num_classes, dtype=jnp.float32)
        cls_t += jnp.mean(_ref_bce(pred_cls[i][best_idx], tcls))
    box_t /= B; obj_t /= B; cls_t /= B
    return lambda_coord * box_t + obj_t + cls_t


# ----------------------------------------------------------------------------
if __name__ == "__main__":
    key = jax.random.PRNGKey(0)
    B, N, M, C = 2, 2500, 8, 8   # batch, anchors/image, targets/image, classes
    keys = jax.random.split(key, 8)

    # predicted boxes: centers + sizes -> corners (x1, y1, x2, y2)
    p_xy = jax.random.uniform(keys[0], (B, N, 2), minval=0.1, maxval=0.9)
    p_wh = jax.random.uniform(keys[1], (B, N, 2), minval=0.05, maxval=0.3)
    pred_boxes = jnp.concatenate([p_xy - p_wh / 2, p_xy + p_wh / 2], axis=-1)
    pred_conf = jax.random.normal(keys[2], (B, N, 1), dtype=jnp.float32)
    pred_cls = jax.random.normal(keys[3], (B, N, C), dtype=jnp.float32)

    t_xy = jax.random.uniform(keys[4], (B, M, 2), minval=0.1, maxval=0.9)
    t_wh = jax.random.uniform(keys[5], (B, M, 2), minval=0.05, maxval=0.3)
    tgt_boxes = jnp.concatenate([t_xy - t_wh / 2, t_xy + t_wh / 2], axis=-1)
    tgt_labels = jax.random.randint(keys[6], (B, M), 0, C)

    # Main run: B=2, tn=1024 -> 3 chunks per image (multi-chunk running best,
    # anchor padding 2500 -> 3072 exercised).
    loss_fn = jax.jit(functools.partial(
        yolo_loss, num_classes=C, anchor_chunk=1024))
    total, loss_dict = loss_fn(pred_boxes, pred_conf, pred_cls,
                               tgt_boxes, tgt_labels)
    total = jax.block_until_ready(total)

    ref_total = reference_yolo_loss(pred_boxes, pred_conf, pred_cls,
                                    tgt_boxes, tgt_labels, C)
    assert abs(float(total) - float(ref_total)) < 5e-3, (
        f"mismatch: kernel={float(total)} ref={float(ref_total)}")

    # B == 1 path: automatically uses a 2-way anchor split (v7x: both TCs busy).
    t1, _ = loss_fn(pred_boxes[:1], pred_conf[:1], pred_cls[:1],
                    tgt_boxes[:1], tgt_labels[:1])
    t1 = jax.block_until_ready(t1)
    ref1 = reference_yolo_loss(pred_boxes[:1], pred_conf[:1], pred_cls[:1],
                               tgt_boxes[:1], tgt_labels[:1], C)
    assert abs(float(t1) - float(ref1)) < 5e-3, (
        f"split-path mismatch: kernel={float(t1)} ref={float(ref1)}")

    print("KERNEL_OK")
</pallas_src>

<mosaic_0001>
module attributes {stable_mosaic.version = 11 : i64} {
  func.func @yolo_match_kernel(%arg0: i32, %arg1: i32, %arg2: i32, %arg3: memref<1x4x1024xf32, #tpu.memory_space<vmem>>, %arg4: memref<1x8x128xf32, #tpu.memory_space<vmem>>, %arg5: memref<1x8x4xf32, #tpu.memory_space<vmem>>, %arg6: memref<1x1x8x128xi32, #tpu.memory_space<vmem>>, %arg7: memref<1x1x8x128xf32, #tpu.memory_space<vmem>>, %arg8: memref<1x1x8x128xf32, #tpu.memory_space<vmem>>, %arg9: memref<8x1xf32, #tpu.memory_space<vmem>>, %arg10: memref<8x1xi32, #tpu.memory_space<vmem>>, %arg11: memref<8x128xf32, #tpu.memory_space<vmem>>) attributes {dimension_semantics = [#tpu.dimension_semantics<parallel>, #tpu.dimension_semantics<parallel>, #tpu.dimension_semantics<arbitrary>], iteration_bounds = array<i64: 2, 1, 3>, scalar_prefetch = 0 : i64, scratch_operands = 3 : i64, tpu.core_type = #tpu.core_type<tc>, window_params = [{transform_indices = @transform_0, window_bounds = array<i64: 1, 4, 1024>}, {transform_indices = @transform_1, window_bounds = array<i64: 1, 8, 128>}, {transform_indices = @transform_2, window_bounds = array<i64: 1, 8, 4>}, {transform_indices = @transform_3, window_bounds = array<i64: 1, 1, 8, 128>}, {transform_indices = @transform_4, window_bounds = array<i64: 1, 1, 8, 128>}, {transform_indices = @transform_5, window_bounds = array<i64: 1, 1, 8, 128>}]} {
    %c0_i32 = arith.constant 0 : i32
    %0 = arith.cmpi eq, %arg2, %c0_i32 : i32
    %1 = arith.extui %0 : i1 to i32
    %c0_i32_0 = arith.constant 0 : i32
    %2 = arith.cmpi ne, %1, %c0_i32_0 : i32
    scf.if %2 {
      %cst_33 = arith.constant -1.000000e+00 : f32
      %92 = vector.broadcast %cst_33 : f32 to vector<8x1xf32>
      %c0_34 = arith.constant 0 : index
      %c0_35 = arith.constant 0 : index
      %93 = vector.load %arg9[%c0_34, %c0_35] : memref<8x1xf32, #tpu.memory_space<vmem>>, vector<8x1xf32>
      tpu.vector_store %arg9[%c0_34, %c0_35], %92 {strides = array<i32>} : memref<8x1xf32, #tpu.memory_space<vmem>>, vector<8x1xf32>,
      %c0_i32_36 = arith.constant 0 : i32
      %94 = vector.broadcast %c0_i32_36 : i32 to vector<8x1xi32>
      %c0_37 = arith.constant 0 : index
      %c0_38 = arith.constant 0 : index
      %95 = vector.load %arg10[%c0_37, %c0_38] : memref<8x1xi32, #tpu.memory_space<vmem>>, vector<8x1xi32>
      tpu.vector_store %arg10[%c0_37, %c0_38], %94 {strides = array<i32>} : memref<8x1xi32, #tpu.memory_space<vmem>>, vector<8x1xi32>,
      %cst_39 = arith.constant 0.000000e+00 : f32
      %96 = vector.broadcast %cst_39 : f32 to vector<8x128xf32>
      %c0_40 = arith.constant 0 : index
      %c0_41 = arith.constant 0 : index
      %97 = vector.load %arg11[%c0_40, %c0_41] : memref<8x128xf32, #tpu.memory_space<vmem>>, vector<8x128xf32>
      tpu.vector_store %arg11[%c0_40, %c0_41], %96 {strides = array<i32>} : memref<8x128xf32, #tpu.memory_space<vmem>>, vector<8x128xf32>,
    } else {
    }
    %c0 = arith.constant 0 : index
    %c0_1 = arith.constant 0 : index
    %c0_2 = arith.constant 0 : index
    %3 = vector.load %arg3[%c0, %c0_1, %c0_2] : memref<1x4x1024xf32, #tpu.memory_space<vmem>>, vector<1x4x1024xf32>
    %4 = vector.shape_cast %3 : vector<1x4x1024xf32> to vector<4x1024xf32>
    %c0_3 = arith.constant 0 : index
    %c0_4 = arith.constant 0 : index
    %c0_5 = arith.constant 0 : index
    %5 = vector.load %arg5[%c0_3, %c0_4, %c0_5] : memref<1x8x4xf32, #tpu.memory_space<vmem>>, vector<1x8x4xf32>
    %6 = vector.shape_cast %5 : vector<1x8x4xf32> to vector<8x4xf32>
    %7 = vector.extract_strided_slice %4 {offsets = [0, 0], sizes = [1, 1024], strides = [1, 1]} : vector<4x1024xf32> to vector<1x1024xf32>
    %8 = vector.extract_strided_slice %4 {offsets = [1, 0], sizes = [1, 1024], strides = [1, 1]} : vector<4x1024xf32> to vector<1x1024xf32>
    %9 = vector.extract_strided_slice %4 {offsets = [2, 0], sizes = [1, 1024], strides = [1, 1]} : vector<4x1024xf32> to vector<1x1024xf32>
    %10 = vector.extract_strided_slice %4 {offsets = [3, 0], sizes = [1, 1024], strides = [1, 1]} : vector<4x1024xf32> to vector<1x1024xf32>
    %11 = vector.extract_strided_slice %6 {offsets = [0, 0], sizes = [8, 1], strides = [1, 1]} : vector<8x4xf32> to vector<8x1xf32>
    %12 = vector.extract_strided_slice %6 {offsets = [0, 1], sizes = [8, 1], strides = [1, 1]} : vector<8x4xf32> to vector<8x1xf32>
    %13 = vector.extract_strided_slice %6 {offsets = [0, 2], sizes = [8, 1], strides = [1, 1]} : vector<8x4xf32> to vector<8x1xf32>
    %14 = vector.extract_strided_slice %6 {offsets = [0, 3], sizes = [8, 1], strides = [1, 1]} : vector<8x4xf32> to vector<8x1xf32>
    %15 = arith.subf %9, %7 : vector<1x1024xf32>
    %16 = arith.subf %10, %8 : vector<1x1024xf32>
    %17 = arith.mulf %15, %16 : vector<1x1024xf32>
    %18 = arith.subf %13, %11 : vector<8x1xf32>
    %19 = arith.subf %14, %12 : vector<8x1xf32>
    %20 = arith.mulf %18, %19 : vector<8x1xf32>
    %21 = vector.broadcast %11 : vector<8x1xf32> to vector<8x1024xf32>
    %22 = vector.broadcast %7 : vector<1x1024xf32> to vector<8x1024xf32>
    %23 = arith.maximumf %21, %22 : vector<8x1024xf32>
    %24 = vector.broadcast %12 : vector<8x1xf32> to vector<8x1024xf32>
    %25 = vector.broadcast %8 : vector<1x1024xf32> to vector<8x1024xf32>
    %26 = arith.maximumf %24, %25 : vector<8x1024xf32>
    %27 = vector.broadcast %13 : vector<8x1xf32> to vector<8x1024xf32>
    %28 = vector.broadcast %9 : vector<1x1024xf32> to vector<8x1024xf32>
    %29 = arith.minimumf %27, %28 : vector<8x1024xf32>
    %30 = vector.broadcast %14 : vector<8x1xf32> to vector<8x1024xf32>
    %31 = vector.broadcast %10 : vector<1x1024xf32> to vector<8x1024xf32>
    %32 = arith.minimumf %30, %31 : vector<8x1024xf32>
    %33 = arith.subf %29, %23 : vector<8x1024xf32>
    %cst = arith.constant 0.000000e+00 : f32
    %34 = vector.broadcast %cst : f32 to vector<8x1024xf32>
    %35 = arith.maximumf %33, %34 : vector<8x1024xf32>
    %36 = arith.subf %32, %26 : vector<8x1024xf32>
    %cst_6 = arith.constant 0.000000e+00 : f32
    %37 = vector.broadcast %cst_6 : f32 to vector<8x1024xf32>
    %38 = arith.maximumf %36, %37 : vector<8x1024xf32>
    %39 = arith.mulf %35, %38 : vector<8x1024xf32>
    %40 = vector.broadcast %17 : vector<1x1024xf32> to vector<8x1024xf32>
    %41 = vector.broadcast %20 : vector<8x1xf32> to vector<8x1024xf32>
    %42 = arith.addf %40, %41 : vector<8x1024xf32>
    %43 = arith.subf %42, %39 : vector<8x1024xf32>
    %cst_7 = arith.constant 9.99999974E-6 : f32
    %44 = vector.broadcast %cst_7 : f32 to vector<8x1024xf32>
    %45 = arith.addf %43, %44 : vector<8x1024xf32>
    %46 = tpu.reciprocal %45 {approx = true} : vector<8x1024xf32> -> vector<8x1024xf32>
    %47 = arith.mulf %45, %46 : vector<8x1024xf32>
    %cst_8 = arith.constant 2.000000e+00 : f32
    %48 = vector.broadcast %cst_8 : f32 to vector<8x1024xf32>
    %49 = arith.subf %48, %47 : vector<8x1024xf32>
    %50 = arith.mulf %46, %49 : vector<8x1024xf32>
    %51 = arith.mulf %39, %50 : vector<8x1024xf32>
    %52 = tpu.iota {dimensions = array<i32: 1>} : vector<8x1024xi32>
    %cst_9 = arith.constant dense<0xFF800000> : vector<8xf32>
    %53 = vector.multi_reduction <maximumf>, %51, %cst_9 [1] : vector<8x1024xf32> to vector<8xf32>
    %54 = vector.shape_cast %53 : vector<8xf32> to vector<8x1xf32>
    %55 = vector.broadcast %54 : vector<8x1xf32> to vector<8x1024xf32>
    %56 = arith.cmpf oeq, %51, %55 : vector<8x1024xf32>
    %c1024_i32 = arith.constant 1024 : i32
    %57 = vector.broadcast %c1024_i32 : i32 to vector<8x1024xi32>
    %58 = arith.select %56, %52, %57 : vector<8x1024xi1>, vector<8x1024xi32>
    %cst_10 = arith.constant dense<2147483647> : vector<8xi32>
    %59 = vector.multi_reduction <minsi>, %58, %cst_10 [1] : vector<8x1024xi32> to vector<8xi32>
    %60 = vector.shape_cast %59 : vector<8xi32> to vector<8x1xi32>
    %c0_11 = arith.constant 0 : index
    %c0_12 = arith.constant 0 : index
    %61 = vector.load %arg9[%c0_11, %c0_12] : memref<8x1xf32, #tpu.memory_space<vmem>>, vector<8x1xf32>
    %62 = arith.cmpf ogt, %54, %61 : vector<8x1xf32>
    %c0_13 = arith.constant 0 : index
    %c0_14 = arith.constant 0 : index
    %63 = vector.load %arg9[%c0_13, %c0_14] : memref<8x1xf32, #tpu.memory_space<vmem>>, vector<8x1xf32>
    %64 = arith.select %62, %54, %63 : vector<8x1xi1>, vector<8x1xf32>
    %c0_15 = arith.constant 0 : index
    %c0_16 = arith.constant 0 : index
    %65 = vector.load %arg9[%c0_15, %c0_16] : memref<8x1xf32, #tpu.memory_space<vmem>>, vector<8x1xf32>
    tpu.vector_store %arg9[%c0_15, %c0_16], %64 {strides = array<i32>} : memref<8x1xf32, #tpu.memory_space<vmem>>, vector<8x1xf32>,
    %c3_i32 = arith.constant 3 : i32
    %66 = arith.muli %arg1, %c3_i32 : i32
    %67 = arith.addi %66, %arg2 : i32
    %c1024_i32_17 = arith.constant 1024 : i32
    %68 = arith.muli %67, %c1024_i32_17 : i32
    %69 = vector.broadcast %68 : i32 to vector<8x1xi32>
    %70 = arith.addi %60, %69 : vector<8x1xi32>
    %c0_18 = arith.constant 0 : index
    %c0_19 = arith.constant 0 : index
    %71 = vector.load %arg10[%c0_18, %c0_19] : memref<8x1xi32, #tpu.memory_space<vmem>>, vector<8x1xi32>
    %72 = arith.select %62, %70, %71 : vector<8x1xi1>, vector<8x1xi32>
    %c0_20 = arith.constant 0 : index
    %c0_21 = arith.constant 0 : index
    %73 = vector.load %arg10[%c0_20, %c0_21] : memref<8x1xi32, #tpu.memory_space<vmem>>, vector<8x1xi32>
    tpu.vector_store %arg10[%c0_20, %c0_21], %72 {strides = array<i32>} : memref<8x1xi32, #tpu.memory_space<vmem>>, vector<8x1xi32>,
    %c0_22 = arith.constant 0 : index
    %c0_23 = arith.constant 0 : index
    %74 = vector.load %arg11[%c0_22, %c0_23] : memref<8x128xf32, #tpu.memory_space<vmem>>, vector<8x128xf32>
    %c0_24 = arith.constant 0 : index
    %c0_25 = arith.constant 0 : index
    %c0_26 = arith.constant 0 : index
    %75 = vector.load %arg4[%c0_24, %c0_25, %c0_26] : memref<1x8x128xf32, #tpu.memory_space<vmem>>, vector<1x8x128xf32>
    %76 = vector.shape_cast %75 : vector<1x8x128xf32> to vector<8x128xf32>
    %cst_27 = arith.constant 0.000000e+00 : f32
    %77 = vector.broadcast %cst_27 : f32 to vector<8x128xf32>
    %78 = arith.maximumf %76, %77 : vector<8x128xf32>
    %79 = math.absf %76 : vector<8x128xf32>
    %cst_28 = arith.constant 0.000000e+00 : f32
    %80 = vector.broadcast %cst_28 : f32 to vector<8x128xf32>
    %81 = arith.subf %80, %79 : vector<8x128xf32>
    %82 = math.exp %81 : vector<8x128xf32>
    %cst_29 = arith.constant 1.000000e+00 : f32
    %83 = vector.broadcast %cst_29 : f32 to vector<8x128xf32>
    %84 = arith.addf %83, %82 : vector<8x128xf32>
    %85 = math.log %84 : vector<8x128xf32>
    %86 = arith.addf %78, %85 : vector<8x128xf32>
    %87 = arith.addf %74, %86 : vector<8x128xf32>
    %c0_30 = arith.constant 0 : index
    %c0_31 = arith.constant 0 : index
    %88 = vector.load %arg11[%c0_30, %c0_31] : memref<8x128xf32, #tpu.memory_space<vmem>>, vector<8x128xf32>
    tpu.vector_store %arg11[%c0_30, %c0_31], %87 {strides = array<i32>} : memref<8x128xf32, #tpu.memory_space<vmem>>, vector<8x128xf32>,
    %c2_i32 = arith.constant 2 : i32
    %89 = arith.cmpi eq, %arg2, %c2_i32 : i32
    %90 = arith.extui %89 : i1 to i32
    %c0_i32_32 = arith.constant 0 : i32
    %91 = arith.cmpi ne, %90, %c0_i32_32 : i32
    scf.if %91 {
      %c0_33 = arith.constant 0 : index
      %c0_34 = arith.constant 0 : index
      %92 = vector.load %arg10[%c0_33, %c0_34] : memref<8x1xi32, #tpu.memory_space<vmem>>, vector<8x1xi32>
      %93 = vector.shape_cast %92 : vector<8x1xi32> to vector<8x1xi32>
      %94 = vector.broadcast %93 : vector<8x1xi32> to vector<8x128xi32>
      %c0_35 = arith.constant 0 : index
      %c0_36 = arith.constant 0 : index
      %c0_37 = arith.constant 0 : index
      %c0_38 = arith.constant 0 : index
      %95 = vector.load %arg6[%c0_35, %c0_36, %c0_37, %c0_38] : memref<1x1x8x128xi32, #tpu.memory_space<vmem>>, vector<1x1x8x128xi32>
      %96 = vector.shape_cast %95 : vector<1x1x8x128xi32> to vector<8x128xi32>
      %97 = vector.shape_cast %94 : vector<8x128xi32> to vector<1x1x8x128xi32>
      tpu.vector_store %arg6[%c0_35, %c0_36, %c0_37, %c0_38], %97 {strides = array<i32>} : memref<1x1x8x128xi32, #tpu.memory_space<vmem>>, vector<1x1x8x128xi32>,
      %c0_39 = arith.constant 0 : index
      %c0_40 = arith.constant 0 : index
      %98 = vector.load %arg9[%c0_39, %c0_40] : memref<8x1xf32, #tpu.memory_space<vmem>>, vector<8x1xf32>
      %99 = vector.shape_cast %98 : vector<8x1xf32> to vector<8x1xf32>
      %100 = vector.broadcast %99 : vector<8x1xf32> to vector<8x128xf32>
      %c0_41 = arith.constant 0 : index
      %c0_42 = arith.constant 0 : index
      %c0_43 = arith.constant 0 : index
      %c0_44 = arith.constant 0 : index
      %101 = vector.load %arg7[%c0_41, %c0_42, %c0_43, %c0_44] : memref<1x1x8x128xf32, #tpu.memory_space<vmem>>, vector<1x1x8x128xf32>
      %102 = vector.shape_cast %101 : vector<1x1x8x128xf32> to vector<8x128xf32>
      %103 = vector.shape_cast %100 : vector<8x128xf32> to vector<1x1x8x128xf32>
      tpu.vector_store %arg7[%c0_41, %c0_42, %c0_43, %c0_44], %103 {strides = array<i32>} : memref<1x1x8x128xf32, #tpu.memory_space<vmem>>, vector<1x1x8x128xf32>,
      %c0_45 = arith.constant 0 : index
      %c0_46 = arith.constant 0 : index
      %104 = vector.load %arg11[%c0_45, %c0_46] : memref<8x128xf32, #tpu.memory_space<vmem>>, vector<8x128xf32>
      %105 = vector.shape_cast %104 : vector<8x128xf32> to vector<1x8x128xf32>
      %cst_47 = arith.constant dense<0.000000e+00> : vector<1xf32>
      %106 = vector.multi_reduction <add>, %105, %cst_47 [1, 2] : vector<1x8x128xf32> to vector<1xf32>
      %107 = vector.shape_cast %106 : vector<1xf32> to vector<1x1x1xf32>
      %108 = vector.extract %107[0, 0, 0] : f32 from vector<1x1x1xf32>
      %109 = vector.broadcast %108 : f32 to vector<8x128xf32>
      %c0_48 = arith.constant 0 : index
      %c0_49 = arith.constant 0 : index
      %c0_50 = arith.constant 0 : index
      %c0_51 = arith.constant 0 : index
      %110 = vector.load %arg8[%c0_48, %c0_49, %c0_50, %c0_51] : memref<1x1x8x128xf32, #tpu.memory_space<vmem>>, vector<1x1x8x128xf32>
      %111 = vector.shape_cast %110 : vector<1x1x8x128xf32> to vector<8x128xf32>
      %112 = vector.shape_cast %109 : vector<8x128xf32> to vector<1x1x8x128xf32>
      tpu.vector_store %arg8[%c0_48, %c0_49, %c0_50, %c0_51], %112 {strides = array<i32>} : memref<1x1x8x128xf32, #tpu.memory_space<vmem>>, vector<1x1x8x128xf32>,
    } else {
    }
    return
  }
  func.func @transform_0(%arg0: i32, %arg1: i32, %arg2: i32) -> (i32, i32, i32) {
    %c3_i32 = arith.constant 3 : i32
    %0 = arith.muli %arg1, %c3_i32 : i32
    %1 = arith.addi %0, %arg2 : i32
    %c0_i32 = arith.constant 0 : i32
    %c0_i32_0 = arith.constant 0 : i32
    return %arg0, %c0_i32, %1 : i32, i32, i32
  }
  func.func @transform_1(%arg0: i32, %arg1: i32, %arg2: i32) -> (i32, i32, i32) {
    %c3_i32 = arith.constant 3 : i32
    %0 = arith.muli %arg1, %c3_i32 : i32
    %1 = arith.addi %0, %arg2 : i32
    %c0_i32 = arith.constant 0 : i32
    %c0_i32_0 = arith.constant 0 : i32
    return %arg0, %1, %c0_i32 : i32, i32, i32
  }
  func.func @transform_2(%arg0: i32, %arg1: i32, %arg2: i32) -> (i32, i32, i32) {
    %c0_i32 = arith.constant 0 : i32
    %c0_i32_0 = arith.constant 0 : i32
    %c0_i32_1 = arith.constant 0 : i32
    return %arg0, %c0_i32, %c0_i32_0 : i32, i32, i32
  }
  func.func @transform_3(%arg0: i32, %arg1: i32, %arg2: i32) -> (i32, i32, i32, i32) {
    %c0_i32 = arith.constant 0 : i32
    %c0_i32_0 = arith.constant 0 : i32
    %c0_i32_1 = arith.constant 0 : i32
    return %arg0, %arg1, %c0_i32, %c0_i32_0 : i32, i32, i32, i32
  }
  func.func @transform_4(%arg0: i32, %arg1: i32, %arg2: i32) -> (i32, i32, i32, i32) {
    %c0_i32 = arith.constant 0 : i32
    %c0_i32_0 = arith.constant 0 : i32
    %c0_i32_1 = arith.constant 0 : i32
    return %arg0, %arg1, %c0_i32, %c0_i32_0 : i32, i32, i32, i32
  }
  func.func @transform_5(%arg0: i32, %arg1: i32, %arg2: i32) -> (i32, i32, i32, i32) {
    %c0_i32 = arith.constant 0 : i32
    %c0_i32_0 = arith.constant 0 : i32
    %c0_i32_1 = arith.constant 0 : i32
    return %arg0, %arg1, %c0_i32, %c0_i32_0 : i32, i32, i32, i32
  }
}

</mosaic_0001>

<bundles_post_ra>
// kernel: yolo_loss.1
= control target key start
LH: loop header
LB: loop body
LE: loop exit
PB: predicated region body
PF: predicated region fallthrough
CT: control target
= control target key end

     0   :  { %11 = vsyncpa [#allocation6], 0  ;;  %s1981_s0 = inlined_call_operand.vmem [shape: f32[2,4,3072], index: 0, kind: input, shape index: {}]   ;;  %s1982_s1 = inlined_call_operand.vmem [shape: f32[2,24,128], index: 1, kind: input, shape index: {}]   ;;  %s1983_s2 = inlined_call_operand.vmem [shape: f32[2,8,4], index: 2, kind: input, shape index: {}]   ;;  %s1984_s3 = inlined_call_operand.vmem [shape: s32[2,1,8,128], index: 3, kind: output, shape index: {0}]   ;;  %s1985_s4 = inlined_call_operand.hbm [shape: f32[2,1,8,128], index: 4, kind: output, shape index: {1}]   ;;  %s1986_s5 = inlined_call_operand.vmem [shape: f32[2,1,8,128], index: 5, kind: output, shape index: {2}]  }
   0x1   :  { %13 = vsyncpa [#allocation6 + $0x1], 0  ;;  %s1548_s18 = smov 0   ;;  %s1550_s19 = smov 0  }
   0x2   :  { %s1552_s20 = smov 0   ;;  %s1554_s21 = smov 0  }
   0x3   :  { %s1556_s22 = smov 0   ;;  %s1558_s23 = smov 0  }
   0x4   :  { %s1560_s24 = smov 0   ;;  %s1562_s25 = smov 0  }
   0x5 LB: > { %1997 = sst [smem:[#allocation8_spill]] %s1477_s18  ;;  %s1276_s26 = sadd.s32 4294967295, %s1505_s25   ;;  %s1505_s25 = sphi %s1562_s25, %s19_s25   ;;  %s1501_s24 = sphi %s1560_s24, %s2022_s24   ;;  %s1497_s23 = sphi %s1558_s23, %s2021_s23   ;;  %s1493_s22 = sphi %s1556_s22, %s2020_s22   ;;  %s1489_s21 = sphi %s1554_s21, %s2019_s21   ;;  %s1485_s20 = sphi %s1552_s20, %s2018_s20   ;;  %s1481_s19 = sphi %s1550_s19, %s2024_s19   ;;  %s1477_s18 = sphi %s1548_s18, %s2023_s18  }
   0x6   : > { %1998 = sst [smem:[#allocation9_spill]] %s1485_s20  ;;  %s1277_s27 = sadd.s32 4294967294, %s1505_s25  }
   0x7   : > { %1999 = sst [smem:[#allocation10_spill]] %s1497_s23  ;;  %s31_s28 = sadd.s32 1, %s1497_s23 }
   0x8   : > { %2000 = sst [smem:[#allocation11_spill]] %s1501_s24  ;;  %p32_p0 = scmp.ge.s32.totalorder %s31_s28, 3 }
   0x9   : > { %2001 = sst [smem:[#allocation12_spill]] %s1505_s25  ;;  %s38_s29 = sadd.s32 1, %s1501_s24 }
   0xa   : > { %p175_p1 = scmp.ne.s32.totalorder %s1485_s20, %s1481_s19  ;;  %p176_p2 = scmp.eq.s32.totalorder %s1276_s26, 5 }
   0xb   : > { %s2026_s28 = smov (%p32_p0, %s31_s28), 0  ;;  %s2028_s29 = smov (!%p32_p0, %s38_s29), %s1501_s24 }
   0xc   : > { %2002 = sst [smem:[#allocation13_spill]] %s2026_s28  ;;  %p1597_p3 = por %p176_p2, %p175_p1 }
   0xd   : > { %p181_p4 = scmp.ne.s32.totalorder %s1481_s19, %s1477_s18  ;;  %p40_p5 = scmp.ge.s32.totalorder %s2028_s29, 2 }
   0xe   : > { %p182_p6 = scmp.eq.s32.totalorder %s1277_s27, 5  ;;  %p1280_p7 = scmp.ge.s32.totalorder %s1505_s25, 1 }
   0xf   : > { %p267_p8 = scmp.lt.s32.totalorder %s1505_s25, 7  ;;  %s2030_s29 = smov (%p40_p5, %s2028_s29), 0 }
  0x10   : > { %2004 = sst [smem:[#allocation14_spill]] %s2030_s29  ;;  %p1607_p9 = por %p182_p6, %p181_p4 }
  0x11   : > { %p268_p10 = pnand %p1280_p7, %p267_p8  ;;  %s160_s7 = ssub.s32 %s1501_s24, %s2030_s29 }
  0x12   : > { %s2005_s6 = scalar_select %p1607_p9, 1, 0 }
  0x13   : > { %s165_s8 = sadd.s32 1, %s1485_s20  ;;  %p163_p11 = scmp.eq.s32.totalorder %s160_s7, 0 }
  0x14   : > { %2006 = sst [smem:[#allocation15_spill]] %s2005_s6  ;;  %271 = sbr.rel (%p268_p10) target bundleno = 1052 (0x41c), region = 32 }
  0x15   : > { %s1615_s9 = scalar_select %p163_p11, %s1485_s20, %s165_s8  }
  0x16   : > { %s1987_s10 = sand.u32 (!%p268_p10), 1, %s1481_s19   ;;  %s1282_s11 = sshll.u32 (!%p268_p10), %s1489_s21, 3 }
  0x17   : > { %2007 = sst [smem:[#allocation16_spill]] %s1615_s9  ;;  %s1621_s12 = sshll.u32 (!%p268_p10), %s1987_s10, 3 }
  0x18   : > { %p332_p12 = scmp.lt.s32.totalorder (!%p268_p10), %s1493_s22, 1  ;;  %p334_p13 = scmp.lt.s32.totalorder (!%p268_p10), %s1282_s11, 23 }
  0x19   : > { %p347_p0 = scmp.lt.s32.totalorder (!%p268_p10), %s1489_s21, 2  ;;  %s319_s27 = scalar_lea.vmem (!%p268_p10), [#allocation5], %s1621_s12 }
  0x1a   : > { %p1288_p1 = scmp.ne.s32.totalorder (!%p268_p10), %s1489_s21, 0 }
  0x1b   : > { %s333_s13 = scalar_select %p332_p12, %s1493_s22, 1 }
  0x1c   : > { %s2032_s11 = smov (!%p334_p13, %s1282_s11), 23  ;;  %vm377_vm0 = vcmask (!%p1288_p1), 7168   ;;  %v1507_v0 = vmov (!%p1288_p1), -1.0   ;;  %v1508_v1 = vmov (!%p1288_p1), 0   ;;  %v1509_v2 = vmov (!%p1288_p1), 0.0  }
  0x1d   : > { %s1299_s14 = smul.u32 24, %s333_s13  ;;  %s1626_s16 = sshll.u32 %s333_s13, 3  ;;  %378 = vst.msk [vmem:[#allocation2] sm:$0xff] (!%p1288_p1), %vm377_vm0, %v1507_v0  ;;  %379 = vst.msk [vmem:[#allocation3] sm:$0xff] (!%p1288_p1), %vm377_vm0, %v1508_v1 }
  0x1e   : > { %s1300_s15 = smul.u32 3, %s333_s13  ;;  %s358_s7 = scalar_lea.vmem %s1983_s2, %s1626_s16  ;;  %380 = vst [vmem:[#allocation4] sm:$0xff] (!%p1288_p1), %v1509_v2 }
  0x1f   : > { %s337_s17 = sadd.s32 %s1299_s14, %s2032_s11  ;;  %s365_s28 = scalar_lea.vmem %s1984_s3, %s1626_s16 }
  0x20   : > { %s1283_s8 = sshll.u32 %s337_s17, 2  ;;  %s372_s6 = scalar_lea.vmem %s1986_s5, %s1626_s16 }
  0x21   : > { %s1639_s9 = scalar_lea.vmem %s1981_s0, %s1283_s8  ;;  %376 = sbr.rel (%p1288_p1) target bundleno = 40 (0x28), region = 36 }
  0x22   : > { %s348_s18 = scalar_select %p347_p0, %s1489_s21, 2 }
  0x24   : > { %s350_s11 = sadd.s32 %s1300_s15, %s348_s18 }
  0x25   : > { %s1284_s14 = sshll.u32 %s350_s11, 3 }
  0x26   : > { %s1649_s17 = scalar_lea.vmem %s1982_s1, %s1284_s14 }
  0x28 PF: > { %v385_v3 = vld [vmem:[%s358_s7] sm:$0xff]  ;;  %s1510_s18 = smov 2   ;;  %v1511_v4 = vmov 0   ;;  %v1512_v5 = vmov 2   ;;  %v1513_v6 = vmov 1   ;;  %v1514_v7 = vmov 3  }
  0x29   : > { %423 = vrot.lane.b32.xlu0 %v385_v3, %s1510_s18  ;;  %1384 = vset.pattern.permute.xlu1 %v1511_v4  ;;  %s1515_s20 = smov 127   ;;  %v1996_v12 = vlaneseq  ;;  %v1655_v15 = vld [vmem:[%s1639_s9] sm:$0xff]  ;;  %v1658_v17 = vld [vmem:[%s1639_s9 + $0x8] sm:$0xff]  ;;  %v1661_v18 = vld [vmem:[%s1639_s9 + $0x10] sm:$0xff]  ;;  %vm1018_vm1 = vcmask 7168   ;;  %s1293_s23 = sshll.u32 %s1489_s21, 10 }
  0x2a   : > { %433 = vperm.xlu1 %1384, %v385_v3   ;;  %1386 = vset.pattern.permute.xlu0 %v1512_v5  ;;  %v1664_v19 = vld [vmem:[%s1639_s9 + $0x18] sm:$0xff]  ;;  %v390_v33 = vrot.slane %v1655_v15, 6  ;;  %v391_v42 = vrot.slane %v1658_v17, 6  ;;  %v392_v43 = vrot.slane %v1661_v18, 6  ;;  %p1294_p2 = scmp.ne.s32.totalorder %s1489_s21, 2 }
  0x2b   : > { %v437_v13 = vshrl.u32 %v1996_v12, 7  ;;  %v393_v44 = vrot.slane %v1664_v19, 6 }
  0x2c   : > { %v398_v50 = vsub.f32 %v1655_v15, %v390_v33  ;;  %v399_v58 = vsub.f32 %v1658_v17, %v391_v42  ;;  %v400_v59 = vsub.f32 %v1661_v18, %v392_v43 }
  0x2d   : > { %v438_v14 = vsub.s32 0, %v437_v13  ;;  %v442_v16 = vsub.s32 4, %v437_v13  ;;  %v522_v28 = vsub.s32 1, %v437_v13  ;;  %v526_v30 = vsub.s32 5, %v437_v13 }
  0x2e   : > { %1385 = vset.pattern.permute.xlu1 %v1513_v6  ;;  %v1676_v31 = vsub.s32 2, %v437_v13  ;;  %v1678_v32 = vsub.s32 6, %v437_v13  ;;  %v1685_v36 = vsub.s32 3, %v437_v13  ;;  %v401_v60 = vsub.f32 %v1664_v19, %v393_v44 }
  0x2f   : > { %517 = vperm.xlu1 %1385, %v385_v3   ;;  %v439_v20 = vrot.slane %v1655_v15, %v438_v14  ;;  %v443_v21 = vrot.slane %v1655_v15, %v442_v16  ;;  %v447_v22 = vrot.slane %v1658_v17, %v438_v14  ;;  %v451_v23 = vrot.slane %v1658_v17, %v442_v16 }
  0x30   : > { %v455_v24 = vrot.slane %v1661_v18, %v438_v14  ;;  %v459_v25 = vrot.slane %v1661_v18, %v442_v16  ;;  %v463_v26 = vrot.slane %v1664_v19, %v438_v14  ;;  %v467_v27 = vrot.slane %v1664_v19, %v442_v16 }
  0x31   : > { %v1674_v29 = vrot.slane %v439_v20, %v438_v14  ;;  %v1681_v34 = vrot.slane %v443_v21, %v438_v14  ;;  %v1683_v35 = vrot.slane %v447_v22, %v438_v14  ;;  %v1687_v37 = vrot.slane %v451_v23, %v438_v14 }
  0x32   : > { %v1689_v38 = vrot.slane %v455_v24, %v438_v14  ;;  %v1691_v39 = vrot.slane %v459_v25, %v438_v14  ;;  %v1693_v40 = vrot.slane %v463_v26, %v438_v14  ;;  %v1700_v45 = vrot.slane %v467_v27, %v438_v14 }
  0x33   : > { %1387 = vset.pattern.permute.xlu1 %v1514_v7  ;;  %v523_v47 = vrot.slane %v1655_v15, %v522_v28  ;;  %v527_v48 = vrot.slane %v1655_v15, %v526_v30  ;;  %v531_v49 = vrot.slane %v1658_v17, %v522_v28  ;;  %v535_v53 = vrot.slane %v1658_v17, %v526_v30 }
  0x34   : > { %685 = vperm.xlu1 %1387, %v385_v3   ;;  %v539_v56 = vrot.slane %v1661_v18, %v522_v28  ;;  %v543_v57 = vrot.slane %v1661_v18, %v526_v30  ;;  %v547_v61 = vrot.slane %v1664_v19, %v522_v28  ;;  %v551_v62 = vrot.slane %v1664_v19, %v526_v30 }
  0x35   : > { %v1724_v63 = vrot.slane %v523_v47, %v522_v28  ;;  %v1726_v0 = vrot.slane %v527_v48, %v522_v28  ;;  %v1728_v1 = vrot.slane %v531_v49, %v522_v28  ;;  %v1289_v2 = vrot.slane %v398_v50, 9 }
  0x36   : > { %v1738_v7 = vrot.slane %v539_v56, %v522_v28  ;;  %v1291_v14 = vrot.slane %v400_v59, 9  ;;  %v1292_v16 = vrot.slane %v401_v60, 9  ;;  %v1744_v20 = vrot.slane %v547_v61, %v522_v28 }
  0x37   : > { %v1746_v21 = vrot.slane %v551_v62, %v522_v28  ;;  %v1754_v25 = vmul.f32 %v1289_v2, %v398_v50  ;;  %v691_v26 = vrot.slane %v1655_v15, %v1685_v36  ;;  %v699_v27 = vrot.slane %v1658_v17, %v1685_v36 }
  0x38   : > { %1388 = vset.pattern.permute.xlu1 %v1512_v5  ;;  %v1734_v5 = vrot.slane %v535_v53, %v522_v28  ;;  %v707_v33 = vrot.slane %v1661_v18, %v1685_v36  ;;  %v715_v42 = vrot.slane %v1664_v19, %v1685_v36  ;;  %v1770_v44 = vmul.f32 %v1291_v14, %v400_v59 }
  0x39   : > { %v1772_v47 = vmul.f32 %v1292_v16, %v401_v60  ;;  %v607_v56 = vrot.slane %v1655_v15, %v1676_v31  ;;  %v731_v59 = vrot.slane %v691_v26, %v1685_v36  ;;  %v739_v60 = vrot.slane %v699_v27, %v1685_v36 }
  0x3a   : > { %v611_v2 = vrot.slane %v1655_v15, %v1678_v32 }
  0x9b   : > { %v424_v8 = vpop.permute.xlu0 %423 }
  0x9c   : > { %v426_v9 = vsub.f32 %v385_v3, %v424_v8  ;;  %v1740_v8 = vrot.slane %v543_v57, %v522_v28 }
  0x9e   : > { %428 = vrot.lane.b32.xlu0 %v426_v9, %s1515_s20 }
  0xa2   : > { %601 = vperm.xlu0 %1386, %v385_v3  }
  0xa9   : > { %v1695_v41 = vpop.permute.xlu1 %433 }
  0xaa   : > { %v508_v46 = vmax.f32 %v1695_v41, %v1674_v29  ;;  %v509_v51 = vmax.f32 %v1695_v41, %v1681_v34  ;;  %v510_v52 = vmax.f32 %v1695_v41, %v1683_v35  ;;  %v511_v54 = vmax.f32 %v1695_v41, %v1687_v37 }
  0xab   : > { %v2009_v29 = vmax.f32 %v1695_v41, %v1691_v39  ;;  %v2010_v34 = vmax.f32 %v1695_v41, %v1693_v40  ;;  %v831_v37 = vrot.slane %v1770_v44, %v1676_v31  ;;  %v839_v39 = vrot.slane %v1772_v47, %v1676_v31 }
  0xac   : > { %v843_v40 = vrot.slane %v1772_v47, %v1678_v32 }
  0xae   : > { %v883_v47 = vrot.slane %v843_v40, %v1676_v31 }
 0x110   : > { %v429_v10 = vpop.permute.xlu0 %428 }
 0x111   : > { %v431_v11 = vmul.f32 %v429_v10, %v426_v9  ;;  %v694_v9 = vsub.s32 7, %v437_v13  ;;  %v1742_v10 = vpop.permute.xlu1 %517 }
 0x112   : > { %v592_v22 = vmax.f32 %v1742_v10, %v1724_v63  ;;  %v593_v23 = vmax.f32 %v1742_v10, %v1726_v0  ;;  %v594_v24 = vmax.f32 %v1742_v10, %v1728_v1  ;;  %v595_v13 = vmax.f32 %v1742_v10, %v1734_v5 }
 0x113   : > { %886 = vperm.xlu1 %1388, %v431_v11   ;;  %v1290_v11 = vrot.slane %v399_v58, 9  ;;  %v695_v28 = vrot.slane %v1655_v15, %v694_v9  ;;  %v703_v30 = vrot.slane %v1658_v17, %v694_v9  ;;  %v596_v48 = vmax.f32 %v1742_v10, %v1738_v7 }
 0x114   : > { %v597_v49 = vmax.f32 %v1742_v10, %v1740_v8  ;;  %v598_v50 = vmax.f32 %v1742_v10, %v1744_v20  ;;  %v599_v53 = vmax.f32 %v1742_v10, %v1746_v21  ;;  %v711_v57 = vrot.slane %v1661_v18, %v694_v9 }
 0x115   : > { %v1768_v43 = vmul.f32 %v1290_v11, %v399_v58  ;;  %v719_v58 = vrot.slane %v1664_v19, %v694_v9  ;;  %v686_v61 = vpop.permute.xlu1 %685  ;;  %v735_v62 = vrot.slane %v695_v28, %v1685_v36  ;;  %v743_v63 = vrot.slane %v703_v30, %v1685_v36 }
 0x116   : > { %v747_v0 = vrot.slane %v707_v33, %v1685_v36  ;;  %v755_v1 = vrot.slane %v715_v42, %v1685_v36  ;;  %v615_v5 = vrot.slane %v1658_v17, %v1676_v31  ;;  %v619_v7 = vrot.slane %v1658_v17, %v1678_v32 }
 0x117   : > { %v623_v8 = vrot.slane %v1661_v18, %v1676_v31  ;;  %v627_v9 = vrot.slane %v1661_v18, %v1678_v32  ;;  %v631_v10 = vrot.slane %v1664_v19, %v1676_v31  ;;  %v635_v11 = vrot.slane %v1664_v19, %v1678_v32 }
 0x118   : > { %v647_v15 = vrot.slane %v607_v56, %v1676_v31  ;;  %v751_v14 = vrot.slane %v711_v57, %v1685_v36  ;;  %v759_v16 = vrot.slane %v719_v58, %v1685_v36  ;;  %v760_v20 = vmin.f32 %v686_v61, %v731_v59 }
 0x119   : > { %v762_v17 = vmin.f32 %v686_v61, %v739_v60  ;;  %v761_v21 = vmin.f32 %v686_v61, %v735_v62  ;;  %v763_v26 = vmin.f32 %v686_v61, %v743_v63  ;;  %v764_v27 = vmin.f32 %v686_v61, %v747_v0 }
 0x11a   : > { %v766_v28 = vmin.f32 %v686_v61, %v755_v1  ;;  %v651_v18 = vrot.slane %v611_v2, %v1676_v31  ;;  %v655_v30 = vrot.slane %v615_v5, %v1676_v31  ;;  %v659_v33 = vrot.slane %v619_v7, %v1676_v31 }
 0x11b   : > { %v663_v19 = vrot.slane %v623_v8, %v1676_v31  ;;  %v667_v56 = vrot.slane %v627_v9, %v1676_v31  ;;  %v671_v57 = vrot.slane %v631_v10, %v1676_v31  ;;  %v675_v36 = vrot.slane %v635_v11, %v1676_v31 }
 0x11c   : > { %v815_v58 = vrot.slane %v1754_v25, %v1676_v31  ;;  %v765_v59 = vmin.f32 %v686_v61, %v751_v14  ;;  %v767_v60 = vmin.f32 %v686_v61, %v759_v16  ;;  %v784_v62 = vsub.f32 %v760_v20, %v592_v22 }
 0x11d   : > { %v786_v63 = vsub.f32 %v762_v17, %v594_v24  ;;  %v785_v0 = vsub.f32 %v761_v21, %v593_v23  ;;  %v787_v1 = vsub.f32 %v763_v26, %v595_v13  ;;  %v788_v2 = vsub.f32 %v764_v27, %v596_v48 }
 0x11e   : > { %v790_v5 = vsub.f32 %v766_v28, %v598_v50  ;;  %v819_v9 = vrot.slane %v1754_v25, %v1678_v32  ;;  %v789_v3 = vsub.f32 %v765_v59, %v597_v49  ;;  %v791_v55 = vsub.f32 %v767_v60, %v599_v53 }
 0x11f   : > { %v792_v14 = vmax.f32 %v784_v62, 0.0  ;;  %v794_v61 = vmax.f32 %v786_v63, 0.0  ;;  %v793_v22 = vmax.f32 %v785_v0, 0.0  ;;  %v795_v24 = vmax.f32 %v787_v1, 0.0 }
 0x120   : > { %v796_v23 = vmax.f32 %v788_v2, 0.0  ;;  %v798_v13 = vmax.f32 %v790_v5, 0.0  ;;  %v797_v20 = vmax.f32 %v789_v3, 0.0  ;;  %v799_v17 = vmax.f32 %v791_v55, 0.0 }
 0x121   : > { %v602_v42 = vpop.permute.xlu0 %601  ;;  %v827_v35 = vrot.slane %v1768_v43, %v1678_v32  ;;  %v855_v27 = vrot.slane %v815_v58, %v1676_v31 }
 0x122   : > { %v676_v7 = vmin.f32 %v602_v42, %v647_v15  ;;  %v677_v8 = vmin.f32 %v602_v42, %v651_v18  ;;  %v678_v12 = vmin.f32 %v602_v42, %v655_v30  ;;  %v679_v10 = vmin.f32 %v602_v42, %v659_v33 }
 0x123   : > { %v680_v6 = vmin.f32 %v602_v42, %v663_v19  ;;  %v681_v11 = vmin.f32 %v602_v42, %v667_v56  ;;  %v682_v4 = vmin.f32 %v602_v42, %v671_v57  ;;  %v683_v48 = vmin.f32 %v602_v42, %v675_v36 }
 0x124   : > { %v768_v50 = vsub.f32 %v676_v7, %v508_v46  ;;  %v769_v25 = vsub.f32 %v677_v8, %v509_v51  ;;  %v770_v49 = vsub.f32 %v678_v12, %v510_v52  ;;  %v771_v53 = vsub.f32 %v679_v10, %v511_v54 }
 0x125   : > { %v2008_v15 = vmax.f32 %v1695_v41, %v1689_v38  ;;  %v773_v46 = vsub.f32 %v681_v11, %v2009_v29  ;;  %v774_v51 = vsub.f32 %v682_v4, %v2010_v34  ;;  %v823_v12 = vrot.slane %v1768_v43, %v1676_v31 }
 0x126   : > { %v835_v38 = vrot.slane %v1770_v44, %v1678_v32  ;;  %v2011_v52 = vmax.f32 %v1695_v41, %v1700_v45  ;;  %v776_v55 = vmax.f32 %v768_v50, 0.0  ;;  %v777_v3 = vmax.f32 %v769_v25, 0.0 }
 0x127   : > { %v772_v16 = vsub.f32 %v680_v6, %v2008_v15  ;;  %v778_v4 = vmax.f32 %v770_v49, 0.0  ;;  %v779_v6 = vmax.f32 %v771_v53, 0.0  ;;  %v781_v21 = vmax.f32 %v773_v46, 0.0 }
 0x128   : > { %v775_v54 = vsub.f32 %v683_v48, %v2011_v52  ;;  %v782_v26 = vmax.f32 %v774_v51, 0.0  ;;  %v859_v44 = vrot.slane %v819_v9, %v1676_v31  ;;  %v863_v28 = vrot.slane %v823_v12, %v1676_v31 }
 0x129   : > { %v780_v43 = vmax.f32 %v772_v16, 0.0  ;;  %v867_v18 = vrot.slane %v827_v35, %v1676_v31  ;;  %v871_v32 = vrot.slane %v831_v37, %v1676_v31  ;;  %v875_v41 = vrot.slane %v835_v38, %v1676_v31 }
 0x12a   : > { %v879_v45 = vrot.slane %v839_v39, %v1676_v31  ;;  %v783_v30 = vmax.f32 %v775_v54, 0.0  ;;  %v1864_v33 = vmul.f32 %v792_v14, %v776_v55  ;;  %v1866_v19 = vmul.f32 %v793_v22, %v777_v3 }
 0x12b   : > { %v1868_v42 = vmul.f32 %v794_v61, %v778_v4  ;;  %v1870_v57 = vmul.f32 %v795_v24, %v779_v6  ;;  %v1872_v36 = vmul.f32 %v796_v23, %v780_v43  ;;  %v1874_v58 = vmul.f32 %v797_v20, %v781_v21 }
 0x12c   : > { %v1876_v59 = vmul.f32 %v798_v13, %v782_v26  ;;  %v807_v11 = vmul.f32 %v799_v17, %v783_v30 }
 0x192   : > { %v887_v56 = vpop.permute.xlu1 %886 }
 0x193   : > { %v889_v60 = vadd.f32 %v887_v56, %v855_v27  ;;  %v890_v62 = vadd.f32 %v887_v56, %v859_v44  ;;  %v891_v63 = vadd.f32 %v887_v56, %v863_v28  ;;  %v892_v31 = vadd.f32 %v887_v56, %v867_v18 }
 0x194   : > { %v893_v0 = vadd.f32 %v887_v56, %v871_v32  ;;  %v894_v1 = vadd.f32 %v887_v56, %v875_v41  ;;  %v895_v2 = vadd.f32 %v887_v56, %v879_v45  ;;  %v896_v5 = vadd.f32 %v887_v56, %v883_v47 }
 0x195   : > { %v897_v7 = vsub.f32 %v889_v60, %v1864_v33  ;;  %v898_v8 = vsub.f32 %v890_v62, %v1866_v19  ;;  %v899_v9 = vsub.f32 %v891_v63, %v1868_v42  ;;  %v900_v10 = vsub.f32 %v892_v31, %v1870_v57 }
 0x196   : > { %v901_v14 = vsub.f32 %v893_v0, %v1872_v36  ;;  %v902_v61 = vsub.f32 %v894_v1, %v1874_v58  ;;  %v903_v22 = vsub.f32 %v895_v2, %v1876_v59  ;;  %v904_v48 = vsub.f32 %v896_v5, %v807_v11 }
 0x197   : > { %v905_v24 = vadd.f32 1e-05, %v897_v7  ;;  %v906_v23 = vadd.f32 1e-05, %v898_v8  ;;  %v907_v13 = vadd.f32 1e-05, %v899_v9 }
 0x198   : > { %v908_v50 = vadd.f32 1e-05, %v900_v10  ;;  %v909_v25 = vadd.f32 1e-05, %v901_v14  ;;  %v910_v49 = vadd.f32 1e-05, %v902_v61  ;;  %v2012_v61 = vlaneseq }
 0x199   : > { %1389 = vrcp.f32 %v905_v24  ;;  %v911_v53 = vadd.f32 1e-05, %v903_v22  ;;  %v912_v15 = vadd.f32 1e-05, %v904_v48 }
 0x19a   : > { %1391 = vrcp.f32 %v906_v23 }
 0x19b   : > { %1393 = vrcp.f32 %v907_v13 }
 0x19c   : > { %1395 = vrcp.f32 %v908_v50 }
 0x19d   : > { %1397 = vrcp.f32 %v909_v25 }
 0x19e   : > { %1399 = vrcp.f32 %v910_v49 }
 0x19f   : > { %1401 = vrcp.f32 %v911_v53 }
 0x1a0   : > { %1403 = vrcp.f32 %v912_v15 }
 0x1a3   : > { %v1390_v16 = vpop.eup %1389 }
 0x1a4   : > { %v1392_v29 = vpop.eup %1391  ;;  %v921_v46 = vmul.f32 %v1390_v16, %v905_v24 }
 0x1a5   : > { %v1394_v34 = vpop.eup %1393  ;;  %v922_v51 = vmul.f32 %v1392_v29, %v906_v23 }
 0x1a6   : > { %v1396_v20 = vpop.eup %1395  ;;  %v923_v17 = vmul.f32 %v1394_v34, %v907_v13  ;;  %v929_v12 = vsub.f32 2.0, %v921_v46 }
 0x1a7   : > { %v1398_v35 = vpop.eup %1397  ;;  %v924_v37 = vmul.f32 %v1396_v20, %v908_v50  ;;  %v930_v38 = vsub.f32 2.0, %v922_v51 }
 0x1a8   : > { %v1400_v39 = vpop.eup %1399  ;;  %v925_v40 = vmul.f32 %v1398_v35, %v909_v25  ;;  %v931_v52 = vsub.f32 2.0, %v923_v17  ;;  %v937_v54 = vmul.f32 %v1390_v16, %v929_v12 }
 0x1a9   : > { %v1402_v55 = vpop.eup %1401  ;;  %v926_v3 = vmul.f32 %v1400_v39, %v910_v49  ;;  %v932_v4 = vsub.f32 2.0, %v924_v37  ;;  %v938_v6 = vmul.f32 %v1392_v29, %v930_v38  ;;  %v1015_v29 = vld [vmem:[#allocation2] sm:$0xff] }
 0x1aa   : > { %v1404_v43 = vpop.eup %1403  ;;  %v927_v21 = vmul.f32 %v1402_v55, %v911_v53  ;;  %v933_v26 = vsub.f32 2.0, %v925_v40  ;;  %v939_v27 = vmul.f32 %v1394_v34, %v931_v52  ;;  %v945_v45 = vmul.f32 %v937_v54, %v1864_v33  ;;  %v1029_v40 = vld [vmem:[%s1649_s17] sm:$0xff] }
 0x1ab   : > { %v928_v44 = vmul.f32 %v1404_v43, %v912_v15  ;;  %v934_v28 = vsub.f32 2.0, %v926_v3  ;;  %v940_v18 = vmul.f32 %v1396_v20, %v932_v4  ;;  %v946_v56 = vmul.f32 %v938_v6, %v1866_v19 }
 0x1ac   : > { %v935_v32 = vsub.f32 2.0, %v927_v21  ;;  %v941_v41 = vmul.f32 %v1398_v35, %v933_v26  ;;  %v947_v62 = vmul.f32 %v939_v27, %v1868_v42  ;;  %v954_v42 = vand.u32 127, %v2012_v61 }
 0x1ad   : > { %v936_v47 = vsub.f32 2.0, %v928_v44  ;;  %v942_v30 = vmul.f32 %v1400_v39, %v934_v28  ;;  %v948_v0 = vmul.f32 %v940_v18, %v1870_v57  ;;  %v1031_v52 = vand.u32 2147483647, %v1029_v40  ;;  %v1028_v18 = vld [vmem:[#allocation4] sm:$0xff] }
 0x1ae   : > { %v943_v60 = vmul.f32 %v1402_v55, %v935_v32  ;;  %v949_v63 = vmul.f32 %v941_v41, %v1872_v36  ;;  %v955_v22 = vadd.s32 128, %v954_v42  ;;  %v956_v36 = vadd.s32 256, %v954_v42 }
 0x1af   : > { %v944_v31 = vmul.f32 %v1404_v43, %v936_v47  ;;  %v950_v1 = vmul.f32 %v942_v30, %v1874_v58  ;;  %v957_v24 = vadd.s32 384, %v954_v42  ;;  %v958_v23 = vadd.s32 512, %v954_v42 }
 0x1b0   : > { %v951_v2 = vmul.f32 %v943_v60, %v1876_v59  ;;  %v962_v5 = vmax.f32 %v945_v45, %v949_v63  ;;  %v959_v58 = vadd.s32 640, %v954_v42  ;;  %v960_v13 = vadd.s32 768, %v954_v42 }
 0x1b1   : > { %v952_v7 = vmul.f32 %v944_v31, %v807_v11  ;;  %v963_v8 = vmax.f32 %v946_v56, %v950_v1  ;;  %v961_v59 = vadd.s32 896, %v954_v42  ;;  %v1032_v54 = vsub.f32 0.0, %v1031_v52 }
 0x1b2   : > { %v964_v33 = vmax.f32 %v947_v62, %v951_v2  ;;  %v1030_v44 = vmax.f32 %v1029_v40, 0.0  ;;  %v1023_v60 = vstv %s1293_s23 }
 0x1b3   : > { %v965_v9 = vmax.f32 %v948_v0, %v952_v7  ;;  %v966_v10 = vmax.f32 %v962_v5, %v963_v8  ;;  %v1033_v3 = vmul.f32 1.442695, %v1032_v54  ;;  %v1516_v5 = vmov (!%p1294_p2), 0  }
 0x1b4   : > { %1410 = vset.pattern.permute.xlu1 (!%p1294_p2), %v1516_v5  ;;  %1409 = vset.pattern.permute.xlu0 (!%p1294_p2), %v1516_v5 }
 0x1b5   : > { %v967_v14 = vmax.f32 %v964_v33, %v965_v9  ;;  %1405 = vpow2.f32 %v1033_v3 }
 0x1b7   : > { %v968_v19 = vmax.f32 %v966_v10, %v967_v14 }
 0x1b9   : > { %969 = vmax.xlane.f32.xlu0 %v968_v19 }
 0x1bf   : > { %v1406_v21 = vpop.eup %1405 }
 0x1c0   : > { %v1035_v26 = vadd.f32 1.0, %v1406_v21 }
 0x1c2   : > { %1407 = vlog2.f32 %v1035_v26 }
 0x1cc   : > { %v1408_v27 = vpop.eup %1407 }
 0x1cd   : > { %v1037_v28 = vmul.f32 0.6931472, %v1408_v27 }
 0x1cf   : > { %v1038_v32 = vadd.f32 %v1037_v28, %v1030_v44 }
 0x1d1   : > { %v1039_v41 = vadd.f32 %v1038_v32, %v1028_v18 }
 0x1d3   : > { %1040 = vst [vmem:[#allocation4] sm:$0xff] %v1039_v41 }
 0x246   : > { %v1893_v57 = vpop.xlane.xlu0 %969 }
 0x247   : > { %vm971_vm2 = vcmp.eq.f32.partialorder %v945_v45, %v1893_v57  ;;  %vm972_vm3 = vcmp.eq.f32.partialorder %v946_v56, %v1893_v57  ;;  %vm973_vm4 = vcmp.eq.f32.partialorder %v947_v62, %v1893_v57  ;;  %vm974_vm5 = vcmp.eq.f32.partialorder %v948_v0, %v1893_v57 }
 0x248   : > { %vm975_vm6 = vcmp.eq.f32.partialorder %v949_v63, %v1893_v57  ;;  %vm976_vm7 = vcmp.eq.f32.partialorder %v950_v1, %v1893_v57  ;;  %vm977_vm8 = vcmp.eq.f32.partialorder %v951_v2, %v1893_v57  ;;  %vm978_vm9 = vcmp.eq.f32.partialorder %v952_v7, %v1893_v57  ;;  %v1025_v63 = vld [vmem:[#allocation3] sm:$0xff]  ;;  %v1057_v1 = vld [vmem:[#allocation4] sm:$0xff] (!%p1294_p2) }
 0x249   : > { %v979_v11 = vsel %vm971_vm2, %v954_v42, 1024  ;;  %v980_v48 = vsel %vm972_vm3, %v955_v22, 1024  ;;  %v981_v50 = vsel %vm973_vm4, %v956_v36, 1024  ;;  %v982_v25 = vsel %vm974_vm5, %v957_v24, 1024 }
 0x24a   : > { %v983_v49 = vsel %vm975_vm6, %v958_v23, 1024  ;;  %v984_v53 = vsel %vm976_vm7, %v959_v58, 1024  ;;  %v985_v15 = vsel %vm977_vm8, %v960_v13, 1024  ;;  %v986_v16 = vsel %vm978_vm9, %v961_v59, 1024 }
 0x24b   : > { %vm987_vm10 = vcmp.lt.s32.totalorder %v979_v11, %v983_v49  ;;  %vm989_vm11 = vcmp.lt.s32.totalorder %v980_v48, %v984_v53  ;;  %vm991_vm12 = vcmp.lt.s32.totalorder %v981_v50, %v985_v15  ;;  %vm993_vm13 = vcmp.lt.s32.totalorder %v982_v25, %v986_v16 }
 0x24c   : > { %v988_v46 = vsel %vm987_vm10, %v979_v11, %v983_v49  ;;  %v990_v34 = vsel %vm989_vm11, %v980_v48, %v984_v53  ;;  %v992_v51 = vsel %vm991_vm12, %v981_v50, %v985_v15  ;;  %v994_v20 = vsel %vm993_vm13, %v982_v25, %v986_v16 }
 0x24d   : > { %vm995_vm14 = vcmp.lt.s32.totalorder %v988_v46, %v990_v34  ;;  %vm997_vm15 = vcmp.lt.s32.totalorder %v992_v51, %v994_v20  ;;  %vm1016_vm0 = vcmp.gt.f32.partialorder %v1893_v57, %v1015_v29 }
 0x24e   : > { %v996_v17 = vsel %vm995_vm14, %v988_v46, %v990_v34  ;;  %v998_v12 = vsel %vm997_vm15, %v992_v51, %v994_v20  ;;  %v1017_v35 = vsel %vm1016_vm0, %v1893_v57, %v1015_v29 }
 0x24f   : > { %vm999_vm2 = vcmp.lt.s32.totalorder %v996_v17, %v998_v12  ;;  %1019 = vst.msk [vmem:[#allocation2] sm:$0xff] %vm1018_vm1, %v1017_v35 }
 0x250   : > { %v1000_v37 = vsel %vm999_vm2, %v996_v17, %v998_v12 }
 0x251   : > { %v1002_v38 = vshra.s32 %v1000_v37, 16  ;;  %v1001_v55 = vand.u32 65535, %v1000_v37 }
 0x253   : > { %v1004_v39 = vcvt.s32.f32 %v1002_v38  ;;  %v1003_v6 = vcvt.s32.f32 %v1001_v55 }
 0x255   : > { %1005 = vmin.xlane.f32.xlu1 %v1004_v39 }
 0x256   : > { %v1050_v2 = vld [vmem:[#allocation2] sm:$0xff] (!%p1294_p2) }
 0x266   : > { %1053 = vperm.xlu1 (!%p1294_p2), %1410, %v1050_v2  }
 0x2e2   : > { %v1006_v4 = vpop.xlane.xlu1 %1005 }
 0x2e3   : > { %vm1007_vm3 = vcmp.eq.f32.partialorder %v1004_v39, %v1006_v4  ;;  %v1012_v45 = vcvt.f32.s32 %v1006_v4 }
 0x2e4   : > { %v1008_v43 = vsel %vm1007_vm3, %v1003_v6, inf }
 0x2e5   : > { %1009 = vmin.xlane.f32.xlu0 %v1008_v43  ;;  %v1013_v30 = vshll.u32 %v1012_v45, 16 }
 0x2e6   : > { %v1054_v8 = vpop.permute.xlu1 (!%p1294_p2), %1053 }
 0x2e7   : > { %1056 = vst [vmem:[%s319_s27] sm:$0xff] (!%p1294_p2), %v1054_v8 }
 0x2e9   : > { %1058 = vadd.xlane.f32.xlu0 (!%p1294_p2), %v1057_v1 }
 0x372   : > { %v1010_v47 = vpop.xlane.xlu0 %1009 }
 0x373   : > { %v1011_v56 = vcvt.f32.s32 %v1010_v47 }
 0x374   : > { %1044 = sbr.rel (%p1294_p2) target bundleno = 1027 (0x403), region = 40 }
 0x375   : > { %v1014_v62 = vadd.s32 %v1013_v30, %v1011_v56 }
 0x376   : > { %v1059_v33 = vpop.xlane.xlu0 (!%p1294_p2), %1058 }
 0x377   : > { %v1024_v31 = vadd.s32 %v1023_v60, %v1014_v62  ;;  %v1060_v9 = vrot.slane (!%p1294_p2), %v1059_v33, 4 }
 0x379   : > { %v1026_v0 = vsel %vm1016_vm0, %v1024_v31, %v1025_v63  ;;  %v1061_v10 = vadd.f32 (!%p1294_p2), %v1060_v9, %v1059_v33 }
 0x37a   : > { %1027 = vst.msk [vmem:[#allocation3] sm:$0xff] %vm1018_vm1, %v1026_v0 }
 0x37b   : > { %v1062_v14 = vrot.slane %v1061_v10, 2 }
 0x37d   : > { %v1063_v19 = vadd.f32 %v1062_v14, %v1061_v10 }
 0x37f   : > { %v1064_v42 = vrot.slane %v1063_v19, 1 }
 0x381   : > { %v1045_v7 = vld [vmem:[#allocation3] sm:$0xff]  ;;  %v1065_v22 = vadd.f32 %v1064_v42, %v1063_v19 }
 0x382   : > { %1047 = vperm.xlu0 %1409, %v1045_v7  }
 0x383   : > { %1301 = vpush %v1065_v22 }
 0x3b4   : > { %s1302_s25 = spop %1301 }
 0x3b5   : > { %v1067_v36 = vstv %s1302_s25 }
 0x3b6   : > { %1068 = vst [vmem:[%s372_s6] sm:$0xff] %v1067_v36 }
 0x401   : > { %v1048_v61 = vpop.permute.xlu0 %1047 }
 0x402   : > { %1049 = vst [vmem:[%s365_s28] sm:$0xff] %v1048_v61 }
 0x403 PF: > { %s1296_s10 = sshll.u32 %s1493_s22, 7  ;;  %s1101_s28 = sshll.u32 %s319_s27, 4  ;;  %s1102_s28 = int_to_ptr.vmem [resolvable:$true] %s1101_s28 }
 0x404   : > { %s1930_s8 = scalar_lea.hbm %s1985_s4, %s1296_s10  ;;  %s2013_s13 = sand.u32 1, %s1481_s19  }
 0x405   : > { %s1077_s11 = scalar_lea.sflag [#allocation6], %s2013_s13  ;;  %s1411_s14 = scalar_lea.vmem %s1102_s28, 128 }
 0x406   : > { %p1412_p4 = scmp.ne.s32.totalorder %s1102_s28, %s1411_s14  ;;  %s1517_s6 = smov [#allocation5]  }
 0x407   : > { %s1415_s16 = sshll.u32 %s1517_s6, 4  ;;  %s1416_s16 = int_to_ptr.vmem [resolvable:$false] %s1415_s16 }
 0x408   : > { %p1413_p5 = pnand %p1412_p4, %p1597_p3  ;;  %s1417_s26 = scalar_lea.vmem %s1416_s16, 256 }
 0x409   : > { %p1418_p7 = scmp.lt.s32.totalorder %s1102_s28, %s1416_s16  ;;  %p1419_p8 = scmp.lt.s32.totalorder %s1417_s26, %s1411_s14 }
 0x40a   : > { %p1414_p6 = pneg %p1413_p5 }
 0x40b   : > { %p1420_p10 = por %p1419_p8, %p1418_p7 }
 0x40d   : > { %p1421_p11 = pnand %p1420_p10, %p1414_p6 }
 0x40f   : > { %1424 = shalt.err (!%p1421_p11)
}
 0x410   : > { %s1425_s22 = scalar_lea.hbm %s1930_s8, 128  ;;  %s1429_s27 = scalar_lea.hbm %s1985_s4, 256 }
 0x411   : > { %p1426_p12 = scmp.ne.s32.totalorder %s1930_s8, %s1425_s22  ;;  %p1430_p1 = scmp.lt.u32.totalorder %s1930_s8, %s1985_s4 }
 0x412   : > { %p1431_p2 = scmp.lt.u32.totalorder %s1429_s27, %s1425_s22  ;;  %p1433_p5 = scmp.lt.u32.totalorder %s1425_s22, %s1930_s8 }
 0x413   : > { %p1427_p13 = pnand %p1426_p12, %p1597_p3 }
 0x414   : > { %p1432_p4 = por %p1431_p2, %p1430_p1 }
 0x415   : > { %p1428_p0 = pneg %p1427_p13 }
 0x416   : > { %p1434_p6 = por %p1433_p5, %p1432_p4 }
 0x418   : > { %p1435_p7 = pnand %p1434_p6, %p1428_p0 }
 0x41a   : > { %1438 = shalt.err (!%p1435_p7)
}
 0x41b   : > { %1303 = dma.vmem_to_hbm [thread:$0]  (%p1597_p3), %s1102_s28, 128, %s1930_s8, %s1077_s11  }
 0x41c PF: > { %s2014_s23 = sld [smem:[#allocation12_spill]]  ;;  %s2015_s21 = sld [smem:[#allocation8_spill]] }
 0x422   : > { %p1309_p8 = scmp.ge.s32.totalorder %s2014_s23, 2  ;;  %s1126_s25 = sand.u32 1, %s2015_s21  }
 0x423   : > { %s1127_s29 = scalar_lea.sflag [#allocation6], %s1126_s25 }
 0x424   : > { %p1306_p10 = pnand %p1309_p8, %p1607_p9 }
 0x426   : > { %1472 = dma.done.wait (!%p1306_p10), %s1127_s29, 128  }
 0x427   : > { %1474 = vsyncadd (!%p1306_p10), %s1127_s29, 4294967168  ;;  %s19_s25 = sadd.s32 1, %s2014_s23   ;;  %s2017_s9 = sld [smem:[#allocation9_spill]] }
 0x428   : > { %p16_p11 = scmp.ge.s32.totalorder %s19_s25, 8   ;;  %s2018_s20 = sld [smem:[#allocation16_spill]] }
 0x429   : > { %s2019_s21 = sld [smem:[#allocation10_spill]]  ;;  %s2020_s22 = sld [smem:[#allocation11_spill]] }
 0x42a   : > { %s2021_s23 = sld [smem:[#allocation13_spill]]  ;;  %s2022_s24 = sld [smem:[#allocation14_spill]] }
 0x42b   : > { %s2023_s18 = smov %s1481_s19  ;;  %18 = sbr.rel (!%p16_p11) target bundleno = 5 (0x5), region = 105 }
 0x42d   : > { %s2024_s19 = smov %s2017_s9 }
 0x432   :  { %1142 = vsyncpa [#allocation6], 1 }
 0x433   :  { %1144 = vsyncpa [#allocation6 + $0x1], 1 }

</bundles_post_ra>
